<compile_context>
chip_gen: v7x
topology: tpu7x:2x2x1
jax: 0.10.0
libtpu: 0.0.40
codegen_flags: <defaults>
</compile_context>

<pallas_src>
import functools

import numpy as np
import jax
import jax.numpy as jnp
from jax import lax
from jax.experimental import pallas as pl
from jax.experimental.pallas import tpu as pltpu


# ----------------------------------------------------------------------------
# Parameter / buffer setup (mirrors nn.Module.__init__, done once as glue)
# ----------------------------------------------------------------------------
def make_positional_encoding_table(max_len: int, d_model: int,
                                   dtype=jnp.float32) -> jax.Array:
    """Returns pe of shape (max_len, 1, d_model), identical to the torch buffer."""
    position = jnp.arange(0, max_len, dtype=jnp.float32)[:, None]            # (L, 1)
    div_term = jnp.exp(jnp.arange(0, d_model, 2, dtype=jnp.float32)
                       * (-np.log(10000.0) / d_model))                        # (D/2,)
    pe = jnp.zeros((max_len, d_model), dtype=jnp.float32)
    pe = pe.at[:, 0::2].set(jnp.sin(position * div_term))
    pe = pe.at[:, 1::2].set(jnp.cos(position * div_term))
    # unsqueeze(0).transpose(0, 1) -> (max_len, 1, d_model)
    return pe[:, None, :].astype(dtype)


# ----------------------------------------------------------------------------
# Pallas kernel: out = dropout(x + pe[seq_window]), tiled over seq
# ----------------------------------------------------------------------------
def _hash_u32(x):
    """lowbias32-style integer mixer; good enough avalanche for dropout bits."""
    x = (x ^ (x >> jnp.uint32(16))) * jnp.uint32(0x7FEB352D)
    x = (x ^ (x >> jnp.uint32(15))) * jnp.uint32(0x846CA68B)
    x = x ^ (x >> jnp.uint32(16))
    return x


def _pe_add_dropout_kernel(seed_ref, x_ref, pe_ref, o_ref, *,
                           p, training, tile_s, batch, d_model):
    # x_ref: (tS, B, D) VMEM, pe_ref: (tS, 1, D) VMEM -> broadcast add over batch.
    x = x_ref[...]
    y = x + pe_ref[...].astype(x.dtype)

    if training and p > 0.0:
        keep_prob = 1.0 - p
        i = pl.program_id(0)
        # Global per-element counter (grid-invariant dropout mask).
        s_idx = lax.broadcasted_iota(jnp.int32, y.shape, 0) + i * tile_s
        b_idx = lax.broadcasted_iota(jnp.int32, y.shape, 1)
        d_idx = lax.broadcasted_iota(jnp.int32, y.shape, 2)
        lin = (s_idx * batch + b_idx) * d_model + d_idx
        bits = _hash_u32((lin ^ seed_ref[0]).astype(jnp.uint32))
        # keep element iff uniform(0,1) < keep_prob  <=>  bits < keep_prob * 2^32
        threshold = jnp.uint32(min(int(keep_prob * 4294967296.0), 4294967295))
        keep = bits < threshold
        scale = jnp.asarray(1.0 / keep_prob, dtype=y.dtype)
        y = jnp.where(keep, y * scale, jnp.zeros_like(y))

    o_ref[...] = y.astype(o_ref.dtype)


def positional_encoding_forward(x, pe, *, p=0.1, training=False, seed=0,
                                tile_bytes=2 * 1024 * 1024):
    """x: (S, B, D); pe: (max_len, 1, D). Returns dropout(x + pe[:S])."""
    S, B, D = x.shape
    max_len = pe.shape[0]
    assert S <= max_len, "sequence length exceeds positional table"
    if not (0.0 <= float(p) < 1.0):
        raise ValueError("dropout p must be in [0, 1)")

    # Seq-tile size from a per-tile VMEM byte budget (double-buffered in+out
    # => ~4x this budget resident; safe for v7x's 64 MiB physical VMEM).
    row_bytes = B * D * x.dtype.itemsize
    tS = max(1, min(S, tile_bytes // max(row_bytes, 1)))
    while S % tS != 0:          # keep all blocks full (no partial boundary blocks)
        tS -= 1
    grid = (S // tS,)

    seed_arr = jnp.asarray([int(seed) & 0x7FFFFFFF], dtype=jnp.int32)

    kernel = functools.partial(_pe_add_dropout_kernel, p=float(p),
                               training=bool(training), tile_s=tS,
                               batch=B, d_model=D)

    bytes_accessed = 2 * x.size * x.dtype.itemsize + S * D * pe.dtype.itemsize

    return pl.pallas_call(
        kernel,
        out_shape=jax.ShapeDtypeStruct((S, B, D), x.dtype),
        grid_spec=pltpu.PrefetchScalarGridSpec(
            num_scalar_prefetch=1,                     # seed -> SMEM
            grid=grid,
            in_specs=[
                pl.BlockSpec((tS, B, D), lambda i, seed: (i, 0, 0)),   # x tile
                pl.BlockSpec((tS, 1, D), lambda i, seed: (i, 0, 0)),   # pe window
            ],
            out_specs=pl.BlockSpec((tS, B, D), lambda i, seed: (i, 0, 0)),
        ),
        compiler_params=pltpu.CompilerParams(
            dimension_semantics=("parallel",),         # shard seq tiles across TCs (v7x)
            vmem_limit_bytes=32 * 1024 * 1024,
        ),
        cost_estimate=pl.CostEstimate(flops=S * B * D, transcendentals=0,
                                      bytes_accessed=bytes_accessed),
    )(seed_arr, x, pe)


# ----------------------------------------------------------------------------
# Demo / correctness check
# ----------------------------------------------------------------------------
if __name__ == "__main__":
    d_model = 32
    max_len = 10
    seq_len = 8
    batch = 2
    p_drop = 0.1

    key = jax.random.PRNGKey(0)
    x = jax.random.normal(key, (seq_len, batch, d_model), dtype=jnp.float32)

    pe = make_positional_encoding_table(max_len, d_model)

    # --- eval mode (dropout = identity): exact numeric check vs pure JAX ---
    out_eval = positional_encoding_forward(x, pe, p=p_drop, training=False)
    out_eval = jax.block_until_ready(out_eval)
    ref_eval = x + pe[:seq_len]          # broadcast (S,1,D) over batch
    np.testing.assert_allclose(np.asarray(out_eval), np.asarray(ref_eval),
                               rtol=1e-6, atol=1e-6)

    # --- training mode: in-kernel counter-hash dropout; check semantics ---
    # TODO(synk): mask distribution differs from torch's RNG stream (same
    # Bernoulli(p) semantics, different bit source), so values can't be
    # compared element-for-element against torch with a given torch seed.
    out_train = positional_encoding_forward(x, pe, p=p_drop, training=True,
                                            seed=123)
    out_train = jax.block_until_ready(out_train)
    ref_scaled = np.asarray(ref_eval) / (1.0 - p_drop)
    ot = np.asarray(out_train)
    # every element is either 0 (dropped) or (x+pe)/keep_prob (kept)
    is_zero = np.isclose(ot, 0.0, atol=1e-6)
    is_kept = np.isclose(ot, ref_scaled, rtol=1e-5, atol=1e-6)
    assert np.all(is_zero | is_kept), "dropout output values inconsistent"
    assert is_zero.any() or p_drop == 0.0 or is_kept.all(), "mask degenerate"

    print("KERNEL_OK")
</pallas_src>

<mosaic_0001>
module attributes {stable_mosaic.version = 11 : i64} {
  func.func @_pe_add_dropout_kernel(%arg0: i32, %arg1: memref<1xi32, #tpu.memory_space<smem>>, %arg2: memref<8x2x32xf32, #tpu.memory_space<vmem>>, %arg3: memref<8x1x32xf32, #tpu.memory_space<vmem>>, %arg4: memref<8x2x32xf32, #tpu.memory_space<vmem>>) attributes {dimension_semantics = [#tpu.dimension_semantics<parallel>], iteration_bounds = array<i64: 1>, scalar_prefetch = 1 : i64, scratch_operands = 0 : i64, tpu.core_type = #tpu.core_type<tc>, window_params = [{transform_indices = @transform_0, window_bounds = array<i64: 8, 2, 32>}, {transform_indices = @transform_1, window_bounds = array<i64: 8, 1, 32>}, {transform_indices = @transform_2, window_bounds = array<i64: 8, 2, 32>}]} {
    %c0 = arith.constant 0 : index
    %c0_0 = arith.constant 0 : index
    %c0_1 = arith.constant 0 : index
    %0 = vector.load %arg2[%c0, %c0_0, %c0_1] : memref<8x2x32xf32, #tpu.memory_space<vmem>>, vector<8x2x32xf32>
    %c0_2 = arith.constant 0 : index
    %c0_3 = arith.constant 0 : index
    %c0_4 = arith.constant 0 : index
    %1 = vector.load %arg3[%c0_2, %c0_3, %c0_4] : memref<8x1x32xf32, #tpu.memory_space<vmem>>, vector<8x1x32xf32>
    %2 = vector.broadcast %1 : vector<8x1x32xf32> to vector<8x2x32xf32>
    %3 = arith.addf %0, %2 : vector<8x2x32xf32>
    %c0_5 = arith.constant 0 : index
    %c0_6 = arith.constant 0 : index
    %c0_7 = arith.constant 0 : index
    %4 = vector.load %arg4[%c0_5, %c0_6, %c0_7] : memref<8x2x32xf32, #tpu.memory_space<vmem>>, vector<8x2x32xf32>
    tpu.vector_store %arg4[%c0_5, %c0_6, %c0_7], %3 {strides = array<i32>} : memref<8x2x32xf32, #tpu.memory_space<vmem>>, vector<8x2x32xf32>,
    return
  }
  func.func @transform_0(%arg0: i32, %arg1: memref<1xi32, #tpu.memory_space<smem>>) -> (i32, i32, i32) {
    %c0_i32 = arith.constant 0 : i32
    %c0_i32_0 = arith.constant 0 : i32
    %c0_i32_1 = arith.constant 0 : i32
    return %arg0, %c0_i32, %c0_i32_0 : i32, i32, i32
  }
  func.func @transform_1(%arg0: i32, %arg1: memref<1xi32, #tpu.memory_space<smem>>) -> (i32, i32, i32) {
    %c0_i32 = arith.constant 0 : i32
    %c0_i32_0 = arith.constant 0 : i32
    %c0_i32_1 = arith.constant 0 : i32
    return %arg0, %c0_i32, %c0_i32_0 : i32, i32, i32
  }
  func.func @transform_2(%arg0: i32, %arg1: memref<1xi32, #tpu.memory_space<smem>>) -> (i32, i32, i32) {
    %c0_i32 = arith.constant 0 : i32
    %c0_i32_0 = arith.constant 0 : i32
    %c0_i32_1 = arith.constant 0 : i32
    return %arg0, %c0_i32, %c0_i32_0 : i32, i32, i32
  }
}

</mosaic_0001>

<bundles_post_ra>
// kernel: tpu_custom_call.1
= control target key start
LH: loop header
LB: loop body
LE: loop exit
PB: predicated region body
PF: predicated region fallthrough
CT: control target
= control target key end

     0   :  { %9 = vsyncpa [#allocation5], 0  ;;  %s311_s0 = inlined_call_operand.<no memory space> [shape: s32[1], index: 0, kind: input, shape index: {}]   ;;  %s312_s1 = inlined_call_operand.hbm [shape: f32[8,2,32], index: 1, kind: input, shape index: {}]   ;;  %s313_s2 = inlined_call_operand.hbm [shape: f32[10,1,32], index: 2, kind: input, shape index: {}]   ;;  %s314_s3 = inlined_call_operand.hbm [shape: f32[8,2,32], index: 3, kind: output, shape index: {}]  }
   0x1   :  { %10 = vsyncpa [#allocation8], 0 }
   0x2   :  { %11 = vsyncpa [#allocation6], 0  ;;  %s228_s12 = smov [#allocation4]   ;;  %s156_s16 = scalar_lea.hbm %s312_s1, 256 }
   0x3   :  { %s17_s13 = sshll.u32 %s228_s12, 4  ;;  %p157_p0 = scmp.ne.s32.totalorder %s312_s1, %s156_s16  ;;  %s18_s13 = int_to_ptr.vmem [resolvable:$true] %s17_s13 }
   0x4   :  { %p160_p1 = scmp.lt.u32.totalorder %s156_s16, %s312_s1 }
   0x6   :  { %p162_p2 = pnand %p160_p1, %p157_p0 }
   0x8   :  { %165 = shalt.err (!%p162_p2)
}
   0x9   :  { %s166_s20 = scalar_lea.vmem %s18_s13, 256  ;;  %p171_p4 = scmp.lt.s32.totalorder %s18_s13, %s18_s13 }
   0xa   :  { %p167_p3 = scmp.ne.s32.totalorder %s18_s13, %s166_s20  ;;  %p172_p5 = scmp.lt.s32.totalorder %s166_s20, %s166_s20 }
   0xc   :  { %p173_p6 = por %p172_p5, %p171_p4 }
   0xe   :  { %p174_p7 = pnand %p173_p6, %p167_p3 }
  0x10   :  { %177 = shalt.err (!%p174_p7)
}
  0x11   :  { %s229_s21 = smov 32   ;;  %s230_s22 = smov 2  }
  0x12   :  { %23 = dma.hbm_to_vmem [thread:$0]  %s312_s1, 256, %s18_s13, [#allocation5], %s229_s21, %s229_s21, %s230_s22  }
  0x13   :  { %s231_s25 = smov [#allocation7]   ;;  %s178_s29 = scalar_lea.hbm %s313_s2, 128 }
  0x14   :  { %s29_s26 = sshll.u32 %s231_s25, 4  ;;  %p179_p8 = scmp.ne.s32.totalorder %s313_s2, %s178_s29  ;;  %s30_s26 = int_to_ptr.vmem [resolvable:$true] %s29_s26 }
  0x15   :  { %s180_s7 = scalar_lea.hbm %s313_s2, 160  ;;  %p182_p10 = scmp.lt.u32.totalorder %s178_s29, %s313_s2 }
  0x16   :  { %p181_p9 = scmp.lt.u32.totalorder %s180_s7, %s178_s29 }
  0x18   :  { %p183_p11 = por %p182_p10, %p181_p9 }
  0x1a   :  { %p184_p12 = pnand %p183_p11, %p179_p8 }
  0x1c   :  { %187 = shalt.err (!%p184_p12)
}
  0x1d   :  { %s188_s1 = scalar_lea.vmem %s30_s26, 128  ;;  %p193_p0 = scmp.lt.s32.totalorder %s30_s26, %s30_s26 }
  0x1e   :  { %p189_p13 = scmp.ne.s32.totalorder %s30_s26, %s188_s1  ;;  %p194_p1 = scmp.lt.s32.totalorder %s188_s1, %s188_s1 }
  0x20   :  { %p195_p2 = por %p194_p1, %p193_p0 }
  0x22   :  { %p196_p3 = pnand %p195_p2, %p189_p13 }
  0x24   :  { %199 = shalt.err (!%p196_p3)
}
  0x25   :  { %s232_s10 = smov 16   ;;  %s233_s11 = smov 1  }
  0x26   :  { %35 = dma.hbm_to_vmem [thread:$0]  %s313_s2, 128, %s30_s26, [#allocation8], %s232_s10, %s232_s10, %s233_s11  }
  0x27   :  { %222 = dma.done.wait [#allocation5], 256  }
  0x28   :  { %223 = vsyncadd [#allocation5], 4294967040 }
  0x29   :  { %224 = dma.done.wait [#allocation8], 128  }
  0x2a   :  { %225 = vsyncadd [#allocation8], 4294967168  ;;  %vm114_vm0 = vcmask 254976   ;;  %s234_s14 = smov [#allocation9]   ;;  %v42_v0 = vld [vmem:[#allocation4] sm:$0x3] }
  0x2b   :  { %s285_s15 = sshll.u32 %s234_s14, 4  ;;  %v141_v1 = vld [vmem:[#allocation7] ss:$0 sm:$0xff]  ;;  %v43_v2 = vld [vmem:[#allocation4 + $0x2] sm:$0x3]  ;;  %s129_s15 = int_to_ptr.vmem [resolvable:$true] %s285_s15 }
  0x2c   :  { %v106_v3 = vadd.f32 %v141_v1, %v42_v0  ;;  %v142_v4 = vld [vmem:[#allocation7 + $0x1] ss:$0 sm:$0xff]  ;;  %v44_v5 = vld [vmem:[#allocation4 + $0x4] sm:$0x3]  ;;  %v143_v6 = vld [vmem:[#allocation7 + $0x2] ss:$0 sm:$0xff]  ;;  %p205_p5 = scmp.lt.s32.totalorder %s129_s15, %s129_s15 }
  0x2d   :  { %v107_v7 = vadd.f32 %v142_v4, %v43_v2  ;;  %v108_v8 = vadd.f32 %v143_v6, %v44_v5  ;;  %v45_v9 = vld [vmem:[#allocation4 + $0x6] sm:$0x3]  ;;  %v144_v10 = vld [vmem:[#allocation7 + $0x3] ss:$0 sm:$0xff]  ;;  %v46_v11 = vld [vmem:[#allocation4 + $0x8] sm:$0x3] }
  0x2e   :  { %115 = vst.msk [vmem:[#allocation9] sm:$0x3] %vm114_vm0, %v106_v3  ;;  %v109_v12 = vadd.f32 %v144_v10, %v45_v9  ;;  %v145_v13 = vld [vmem:[#allocation7 + $0x4] ss:$0 sm:$0xff]  ;;  %v47_v14 = vld [vmem:[#allocation4 + $0xa] sm:$0x3] }
  0x2f   :  { %v146_v15 = vld [vmem:[#allocation7 + $0x5] ss:$0 sm:$0xff]  ;;  %116 = vst.msk [vmem:[#allocation9 + $0x2] sm:$0x3] %vm114_vm0, %v107_v7  ;;  %117 = vst.msk [vmem:[#allocation9 + $0x4] sm:$0x3] %vm114_vm0, %v108_v8  ;;  %v110_v16 = vadd.f32 %v145_v13, %v46_v11 }
  0x30   :  { %v111_v17 = vadd.f32 %v146_v15, %v47_v14  ;;  %v48_v18 = vld [vmem:[#allocation4 + $0xc] sm:$0x3]  ;;  %v147_v19 = vld [vmem:[#allocation7 + $0x6] ss:$0 sm:$0xff]  ;;  %v49_v20 = vld [vmem:[#allocation4 + $0xe] sm:$0x3] }
  0x31   :  { %118 = vst.msk [vmem:[#allocation9 + $0x6] sm:$0x3] %vm114_vm0, %v109_v12  ;;  %v112_v21 = vadd.f32 %v147_v19, %v48_v18  ;;  %v148_v22 = vld [vmem:[#allocation7 + $0x7] ss:$0 sm:$0xff]  ;;  %119 = vst.msk [vmem:[#allocation9 + $0x8] sm:$0x3] %vm114_vm0, %v110_v16 }
  0x32   :  { %120 = vst.msk [vmem:[#allocation9 + $0xa] sm:$0x3] %vm114_vm0, %v111_v17  ;;  %v113_v23 = vadd.f32 %v148_v22, %v49_v20  ;;  %s200_s2 = scalar_lea.vmem %s129_s15, 256 }
  0x33   :  { %121 = vst.msk [vmem:[#allocation9 + $0xc] sm:$0x3] %vm114_vm0, %v112_v21  ;;  %p201_p4 = scmp.ne.s32.totalorder %s129_s15, %s200_s2  ;;  %p206_p6 = scmp.lt.s32.totalorder %s200_s2, %s200_s2 }
  0x34   :  { %122 = vst.msk [vmem:[#allocation9 + $0xe] sm:$0x3] %vm114_vm0, %v113_v23 }
  0x35   :  { %p207_p7 = por %p206_p6, %p205_p5 }
  0x37   :  { %p208_p8 = pnand %p207_p7, %p201_p4 }
  0x39   :  { %211 = shalt.err (!%p208_p8)
}
  0x3a   :  { %s212_s17 = scalar_lea.hbm %s314_s3, 256 }
  0x3b   :  { %p213_p9 = scmp.ne.s32.totalorder %s314_s3, %s212_s17  ;;  %p216_p10 = scmp.lt.u32.totalorder %s212_s17, %s314_s3 }
  0x3d   :  { %p218_p11 = pnand %p216_p10, %p213_p9 }
  0x3f   :  { %221 = shalt.err (!%p218_p11)
}
  0x40   :  { %134 = dma.vmem_to_hbm [thread:$0]  %s129_s15, 256, %s314_s3, [#allocation6], %s229_s21, %s229_s21, %s230_s22  }
  0x41   :  { %226 = dma.done.wait [#allocation6], 256  }
  0x42   :  { %227 = vsyncadd [#allocation6], 4294967040 }
  0x43   :  { %138 = vsyncpa [#allocation5], 1 }
  0x44   :  { %139 = vsyncpa [#allocation8], 1 }
  0x45   :  { %140 = vsyncpa [#allocation6], 1 }

</bundles_post_ra>
